<compile_context>
chip_gen: v7x
topology: tpu7x:2x2x1
jax: 0.10.0
libtpu: 0.0.40
codegen_flags: <defaults>
</compile_context>

<pallas_src>
import jax
import jax.numpy as jnp
from jax.experimental import pallas as pl
from jax.experimental.pallas import tpu as pltpu


# ----------------------------- kernel --------------------------------------
def _aspp_kernel(x0_ref, xcol_ref, w0_ref, wd_ref, wp_ref, shift_ref, bias_ref,
                 out_ref):
    """One grid step = one (batch sample, DHW tile).

    x0_ref   : (Cin, sp)           center slab (1x1x1 branch operand), lane-dense
    xcol_ref : (3, 27*Cin, sp)     per-dilation im2col operand, lane-dense
    w0_ref   : (Cout, Cin)         1x1x1 conv weight, BN scale folded
    wd_ref   : (3, Cout, 27*Cin)   dilated 3x3x3 weights, folded to one K each
    wp_ref   : (Cout, 4*Cout)      projection weight for branches 0-3, BN scale folded
    shift_ref: (4, Cout, 1)        BN shifts for branches 0-3 (f32)
    bias_ref : (Cout, 1)           per-sample bias = proj(pool branch) + proj BN shift
    out_ref  : (Cout, sp)          lane-dense output tile (NCDHW order, flat DHW)
    """
    n_dil = wd_ref.shape[0]

    # branch 0: 1x1x1 conv (+folded BN scale) -> shift -> ReLU        (Cout, sp) f32
    ys = [jnp.maximum(
        jnp.dot(w0_ref[...], x0_ref[...], preferred_element_type=jnp.float32)
        + shift_ref[0], 0.0)]

    # branches 1..3: dilated 3x3x3 conv == single K=27*Cin matmul on im2col operand
    for bi in range(n_dil):
        yb = jnp.dot(wd_ref[bi], xcol_ref[bi], preferred_element_type=jnp.float32)
        ys.append(jnp.maximum(yb + shift_ref[1 + bi], 0.0))

    # projection over branches 0-3 fused into one K=4*Cout matmul (sublane concat);
    # the pooling branch and the projection BN shift arrive pre-folded in bias_ref.
    ycat = jnp.concatenate(ys, axis=0).astype(wp_ref.dtype)        # (4*Cout, sp)
    acc = jnp.dot(wp_ref[...], ycat, preferred_element_type=jnp.float32)

    # Dropout(0.5) = identity in eval mode.
    out_ref[...] = jnp.maximum(acc + bias_ref[...], 0.0)


# ----------------------------- wrapper --------------------------------------
def _pick_sp_tile(DHW):
    # lane-dense spatial tile: multiple of 128, prefer >= 2 tiles (v7x dual-TC).
    for t in (2048, 1024, 512, 256, 128):
        if DHW % t == 0 and DHW // t >= 2:
            return t
    return DHW


def aspp_forward(x_ncdhw, kp, rates, compute_dtype=jnp.bfloat16):
    """x_ncdhw: (N, Cin, D, H, W) float32. Returns (N, Cout, D, H, W) float32."""
    N, Cin, D, H, W = x_ncdhw.shape
    Cout = kp["w0"].shape[0]
    DHW = D * H * W
    P = max(rates)
    n_dil = len(rates)

    # ---- pooling branch (global avg pool -> 1x1 conv -> BN -> ReLU -> broadcast)
    # folded wrapper-side into a per-sample projection bias (trilinear upsample of a
    # 1x1x1 map with align_corners=False is a pure broadcast).
    mean = jnp.mean(x_ncdhw.reshape(N, Cin, DHW), axis=2)                 # (N, Cin)
    y4 = jnp.maximum(mean @ kp["w4"].T + kp["shift4"][None, :], 0.0)      # (N, Cout)
    bias = (y4 @ kp["wp4"].T + kp["shift_proj"][None, :])[:, :, None]     # (N, Cout, 1)
    bias = bias.astype(jnp.float32)

    # ---- lane-dense center slab (metadata-only reshape) --------------------
    x0 = x_ncdhw.reshape(N, Cin, DHW).astype(compute_dtype)

    # ---- wrapper-side im2col: (N, n_dil, 27*Cin, DHW), tap-major / channel-minor
    xp = jnp.pad(x_ncdhw, ((0, 0), (0, 0), (P, P), (P, P), (P, P)))
    cols = []
    for r in rates:
        taps = []
        for kz in range(3):
            oz = P + r * (kz - 1)
            for ky in range(3):
                oy = P + r * (ky - 1)
                for kx in range(3):
                    ox = P + r * (kx - 1)
                    taps.append(
                        xp[:, :, oz:oz + D, oy:oy + H, ox:ox + W].reshape(N, Cin, DHW))
        cols.append(jnp.stack(taps, axis=1).reshape(N, 27 * Cin, DHW))
    xcol = jnp.stack(cols, axis=1).astype(compute_dtype)       # (N, 3, 27*Cin, DHW)

    w0 = kp["w0"].astype(compute_dtype)                        # (Cout, Cin)
    wd = kp["wd"].astype(compute_dtype)                        # (3, Cout, 27*Cin)
    wp = kp["wp03"].astype(compute_dtype)                      # (Cout, 4*Cout)
    shift = kp["shift03"].astype(jnp.float32)                  # (4, Cout, 1)

    sp = _pick_sp_tile(DHW)
    n_sp = DHW // sp
    K = 27 * Cin

    out = pl.pallas_call(
        _aspp_kernel,
        out_shape=jax.ShapeDtypeStruct((N, Cout, DHW), jnp.float32),
        grid=(N, n_sp),
        in_specs=[
            pl.BlockSpec((None, Cin, sp), lambda n, s: (n, 0, s)),
            pl.BlockSpec((None, n_dil, K, sp), lambda n, s: (n, 0, 0, s)),
            pl.BlockSpec((Cout, Cin), lambda n, s: (0, 0)),
            pl.BlockSpec((n_dil, Cout, K), lambda n, s: (0, 0, 0)),
            pl.BlockSpec((Cout, 4 * Cout), lambda n, s: (0, 0)),
            pl.BlockSpec((4, Cout, 1), lambda n, s: (0, 0, 0)),
            pl.BlockSpec((None, Cout, 1), lambda n, s: (n, 0, 0)),
        ],
        out_specs=pl.BlockSpec((None, Cout, sp), lambda n, s: (n, 0, s)),
        compiler_params=pltpu.CompilerParams(
            dimension_semantics=("parallel", "parallel"),
            vmem_limit_bytes=32 * 1024 * 1024),
    )(x0, xcol, w0, wd, wp, shift, bias)

    return out.reshape(N, Cout, D, H, W)          # free: NC(DHW) -> NCDHW


# ----------------------------- parameters ---------------------------------
def make_params(key, Cin, Cout, rates):
    eps = 1e-5
    keys = jax.random.split(key, 32)
    ki = iter(range(32))

    def nrm(shape, scale):
        return scale * jax.random.normal(keys[next(ki)], shape, jnp.float32)

    def bn():
        g = 0.5 + jax.random.uniform(keys[next(ki)], (Cout,), jnp.float32)
        b = 0.1 * jax.random.normal(keys[next(ki)], (Cout,), jnp.float32)
        m = 0.1 * jax.random.normal(keys[next(ki)], (Cout,), jnp.float32)
        v = 0.5 + jax.random.uniform(keys[next(ki)], (Cout,), jnp.float32)
        return (g, b, m, v)

    raw = {
        "w0": nrm((Cout, Cin, 1, 1, 1), 1.0 / jnp.sqrt(Cin)),
        "wd": [nrm((Cout, Cin, 3, 3, 3), 1.0 / jnp.sqrt(27 * Cin)) for _ in range(3)],
        "w4": nrm((Cout, Cin, 1, 1, 1), 1.0 / jnp.sqrt(Cin)),
        "wp": nrm((Cout, 5 * Cout, 1, 1, 1), 1.0 / jnp.sqrt(5 * Cout)),
        "bn": [bn() for _ in range(6)],   # 5 branch BNs + projection BN
        "eps": eps,
    }

    # Fold BN (eval mode) to scale/shift; fold the scale into the conv weights and
    # repack everything lane-dense (contraction dim on lanes) for the kernel.
    scales, shifts = [], []
    for (g, b, m, v) in raw["bn"]:
        s = g / jnp.sqrt(v + eps)
        scales.append(s)
        shifts.append(b - m * s)

    w0 = raw["w0"].reshape(Cout, Cin) * scales[0][:, None]               # (Cout, Cin)
    w4 = raw["w4"].reshape(Cout, Cin) * scales[4][:, None]               # (Cout, Cin)
    wd = []
    for i in range(3):
        w = raw["wd"][i] * scales[i + 1][:, None, None, None, None]      # (Cout,Cin,3,3,3)
        # tap-major / channel-minor contraction ordering: (Cout, kz, ky, kx, Cin)
        wd.append(jnp.transpose(w, (0, 2, 3, 4, 1)).reshape(Cout, 27 * Cin))
    wp = raw["wp"].reshape(Cout, 5 * Cout) * scales[5][:, None]          # (Cout, 5*Cout)

    kp = {
        "w0": w0,
        "wd": jnp.stack(wd, axis=0),                    # (3, Cout, 27*Cin)
        "w4": w4,
        "wp03": wp[:, :4 * Cout],                       # projection for branches 0-3
        "wp4": wp[:, 4 * Cout:],                        # projection for pooling branch
        "shift03": jnp.stack(shifts[:4], axis=0)[:, :, None],   # (4, Cout, 1)
        "shift4": shifts[4],                            # (Cout,)
        "shift_proj": shifts[5],                        # (Cout,)
    }
    return raw, kp


# ----------------------------- pure-JAX reference --------------------------
def aspp_reference(x, raw, rates):
    eps = raw["eps"]

    def bnr(y, params):
        g, b, m, v = (p.reshape(1, -1, 1, 1, 1) for p in params)
        return jnp.maximum((y - m) / jnp.sqrt(v + eps) * g + b, 0.0)

    def conv(z, w, dil, pad):
        return jax.lax.conv_general_dilated(
            z, w, window_strides=(1, 1, 1), padding=[(pad, pad)] * 3,
            rhs_dilation=(dil, dil, dil),
            dimension_numbers=("NCDHW", "OIDHW", "NCDHW"),
            precision=jax.lax.Precision.HIGHEST)

    branches = [bnr(conv(x, raw["w0"], 1, 0), raw["bn"][0])]
    for i, r in enumerate(rates):
        branches.append(bnr(conv(x, raw["wd"][i], r, r), raw["bn"][i + 1]))
    gm = jnp.mean(x, axis=(2, 3, 4), keepdims=True)
    y4 = bnr(conv(gm, raw["w4"], 1, 0), raw["bn"][4])
    branches.append(jnp.broadcast_to(y4, branches[0].shape))
    cat = jnp.concatenate(branches, axis=1)
    return bnr(conv(cat, raw["wp"], 1, 0), raw["bn"][5])   # Dropout = identity (eval)


# ----------------------------- main ----------------------------------------
if __name__ == "__main__":
    N, Cin, Cout = 2, 4, 8
    D = H = W = 8
    rates = (1, 2, 3)

    key = jax.random.PRNGKey(0)
    k_x, k_w = jax.random.split(key)
    x = jax.random.normal(k_x, (N, Cin, D, H, W), jnp.float32)   # NCDHW like PyTorch
    raw, kp = make_params(k_w, Cin, Cout, rates)

    ref = jax.block_until_ready(aspp_reference(x, raw, rates))

    # Validate both the f32-operand path and the bf16-operand (v6e/v7x MXU) path.
    for dtype, tol in ((jnp.float32, 5e-3), (jnp.bfloat16, 5e-2)):
        out = jax.block_until_ready(aspp_forward(x, kp, rates, compute_dtype=dtype))
        assert out.shape == (N, Cout, D, H, W), out.shape
        max_err = float(jnp.max(jnp.abs(out - ref)))
        if max_err > tol:
            raise AssertionError(
                f"mismatch vs reference ({dtype.__name__}): max abs err = {max_err}")

    print("KERNEL_OK")
</pallas_src>

<mosaic_0001>
module attributes {stable_mosaic.version = 11 : i64} {
  func.func @_aspp_kernel(%arg0: i32, %arg1: i32, %arg2: memref<1x4x256xf32, #tpu.memory_space<vmem>>, %arg3: memref<1x3x108x256xf32, #tpu.memory_space<vmem>>, %arg4: memref<8x4xf32, #tpu.memory_space<vmem>>, %arg5: memref<3x8x108xf32, #tpu.memory_space<vmem>>, %arg6: memref<8x32xf32, #tpu.memory_space<vmem>>, %arg7: memref<4x8x1xf32, #tpu.memory_space<vmem>>, %arg8: memref<1x8x1xf32, #tpu.memory_space<vmem>>, %arg9: memref<1x8x256xf32, #tpu.memory_space<vmem>>) attributes {dimension_semantics = [#tpu.dimension_semantics<parallel>, #tpu.dimension_semantics<parallel>], iteration_bounds = array<i64: 2, 2>, scalar_prefetch = 0 : i64, scratch_operands = 0 : i64, tpu.core_type = #tpu.core_type<tc>, window_params = [{transform_indices = @transform_0, window_bounds = array<i64: 1, 4, 256>}, {transform_indices = @transform_1, window_bounds = array<i64: 1, 3, 108, 256>}, {pipeline_mode = #tpu.pipeline_mode<synchronous>, transform_indices = @transform_2, window_bounds = array<i64: 8, 4>}, {pipeline_mode = #tpu.pipeline_mode<synchronous>, transform_indices = @transform_3, window_bounds = array<i64: 3, 8, 108>}, {pipeline_mode = #tpu.pipeline_mode<synchronous>, transform_indices = @transform_4, window_bounds = array<i64: 8, 32>}, {pipeline_mode = #tpu.pipeline_mode<synchronous>, transform_indices = @transform_5, window_bounds = array<i64: 4, 8, 1>}, {transform_indices = @transform_6, window_bounds = array<i64: 1, 8, 1>}, {transform_indices = @transform_7, window_bounds = array<i64: 1, 8, 256>}]} {
    %c0 = arith.constant 0 : index
    %c0_0 = arith.constant 0 : index
    %0 = vector.load %arg4[%c0, %c0_0] : memref<8x4xf32, #tpu.memory_space<vmem>>, vector<8x4xf32>
    %c0_1 = arith.constant 0 : index
    %c0_2 = arith.constant 0 : index
    %c0_3 = arith.constant 0 : index
    %1 = vector.load %arg2[%c0_1, %c0_2, %c0_3] : memref<1x4x256xf32, #tpu.memory_space<vmem>>, vector<1x4x256xf32>
    %2 = vector.shape_cast %1 : vector<1x4x256xf32> to vector<4x256xf32>
    %cst = arith.constant dense<0.000000e+00> : vector<8x256xf32>
    %3 = tpu.matmul %0, %2, %cst {dimension_numbers = #tpu.dot_dimension_numbers<[1], [0], [0], [1], [0, 0, 1, 1], [], []>} : vector<8x4xf32>, vector<4x256xf32>, vector<8x256xf32> -> vector<8x256xf32>
    %c0_4 = arith.constant 0 : index
    %c0_5 = arith.constant 0 : index
    %c0_6 = arith.constant 0 : index
    %4 = vector.load %arg7[%c0_4, %c0_5, %c0_6] : memref<4x8x1xf32, #tpu.memory_space<vmem>>, vector<1x8x1xf32>
    %5 = vector.shape_cast %4 : vector<1x8x1xf32> to vector<8x1xf32>
    %6 = vector.broadcast %5 : vector<8x1xf32> to vector<8x256xf32>
    %7 = arith.addf %3, %6 : vector<8x256xf32>
    %cst_7 = arith.constant 0.000000e+00 : f32
    %8 = vector.broadcast %cst_7 : f32 to vector<8x256xf32>
    %9 = arith.maximumf %7, %8 : vector<8x256xf32>
    %c0_8 = arith.constant 0 : index
    %c0_9 = arith.constant 0 : index
    %c0_10 = arith.constant 0 : index
    %10 = vector.load %arg5[%c0_8, %c0_9, %c0_10] : memref<3x8x108xf32, #tpu.memory_space<vmem>>, vector<1x8x108xf32>
    %11 = vector.shape_cast %10 : vector<1x8x108xf32> to vector<8x108xf32>
    %c0_11 = arith.constant 0 : index
    %c0_12 = arith.constant 0 : index
    %c0_13 = arith.constant 0 : index
    %c0_14 = arith.constant 0 : index
    %12 = vector.load %arg3[%c0_11, %c0_12, %c0_13, %c0_14] : memref<1x3x108x256xf32, #tpu.memory_space<vmem>>, vector<1x1x108x256xf32>
    %13 = vector.shape_cast %12 : vector<1x1x108x256xf32> to vector<108x256xf32>
    %cst_15 = arith.constant dense<0.000000e+00> : vector<8x256xf32>
    %14 = tpu.matmul %11, %13, %cst_15 {dimension_numbers = #tpu.dot_dimension_numbers<[1], [0], [0], [1], [0, 0, 1, 1], [], []>} : vector<8x108xf32>, vector<108x256xf32>, vector<8x256xf32> -> vector<8x256xf32>
    %c1 = arith.constant 1 : index
    %c0_16 = arith.constant 0 : index
    %c0_17 = arith.constant 0 : index
    %15 = vector.load %arg7[%c1, %c0_16, %c0_17] : memref<4x8x1xf32, #tpu.memory_space<vmem>>, vector<1x8x1xf32>
    %16 = vector.shape_cast %15 : vector<1x8x1xf32> to vector<8x1xf32>
    %17 = vector.broadcast %16 : vector<8x1xf32> to vector<8x256xf32>
    %18 = arith.addf %14, %17 : vector<8x256xf32>
    %cst_18 = arith.constant 0.000000e+00 : f32
    %19 = vector.broadcast %cst_18 : f32 to vector<8x256xf32>
    %20 = arith.maximumf %18, %19 : vector<8x256xf32>
    %c1_19 = arith.constant 1 : index
    %c0_20 = arith.constant 0 : index
    %c0_21 = arith.constant 0 : index
    %21 = vector.load %arg5[%c1_19, %c0_20, %c0_21] : memref<3x8x108xf32, #tpu.memory_space<vmem>>, vector<1x8x108xf32>
    %22 = vector.shape_cast %21 : vector<1x8x108xf32> to vector<8x108xf32>
    %c0_22 = arith.constant 0 : index
    %c1_23 = arith.constant 1 : index
    %c0_24 = arith.constant 0 : index
    %c0_25 = arith.constant 0 : index
    %23 = vector.load %arg3[%c0_22, %c1_23, %c0_24, %c0_25] : memref<1x3x108x256xf32, #tpu.memory_space<vmem>>, vector<1x1x108x256xf32>
    %24 = vector.shape_cast %23 : vector<1x1x108x256xf32> to vector<108x256xf32>
    %cst_26 = arith.constant dense<0.000000e+00> : vector<8x256xf32>
    %25 = tpu.matmul %22, %24, %cst_26 {dimension_numbers = #tpu.dot_dimension_numbers<[1], [0], [0], [1], [0, 0, 1, 1], [], []>} : vector<8x108xf32>, vector<108x256xf32>, vector<8x256xf32> -> vector<8x256xf32>
    %c2 = arith.constant 2 : index
    %c0_27 = arith.constant 0 : index
    %c0_28 = arith.constant 0 : index
    %26 = vector.load %arg7[%c2, %c0_27, %c0_28] : memref<4x8x1xf32, #tpu.memory_space<vmem>>, vector<1x8x1xf32>
    %27 = vector.shape_cast %26 : vector<1x8x1xf32> to vector<8x1xf32>
    %28 = vector.broadcast %27 : vector<8x1xf32> to vector<8x256xf32>
    %29 = arith.addf %25, %28 : vector<8x256xf32>
    %cst_29 = arith.constant 0.000000e+00 : f32
    %30 = vector.broadcast %cst_29 : f32 to vector<8x256xf32>
    %31 = arith.maximumf %29, %30 : vector<8x256xf32>
    %c2_30 = arith.constant 2 : index
    %c0_31 = arith.constant 0 : index
    %c0_32 = arith.constant 0 : index
    %32 = vector.load %arg5[%c2_30, %c0_31, %c0_32] : memref<3x8x108xf32, #tpu.memory_space<vmem>>, vector<1x8x108xf32>
    %33 = vector.shape_cast %32 : vector<1x8x108xf32> to vector<8x108xf32>
    %c0_33 = arith.constant 0 : index
    %c2_34 = arith.constant 2 : index
    %c0_35 = arith.constant 0 : index
    %c0_36 = arith.constant 0 : index
    %34 = vector.load %arg3[%c0_33, %c2_34, %c0_35, %c0_36] : memref<1x3x108x256xf32, #tpu.memory_space<vmem>>, vector<1x1x108x256xf32>
    %35 = vector.shape_cast %34 : vector<1x1x108x256xf32> to vector<108x256xf32>
    %cst_37 = arith.constant dense<0.000000e+00> : vector<8x256xf32>
    %36 = tpu.matmul %33, %35, %cst_37 {dimension_numbers = #tpu.dot_dimension_numbers<[1], [0], [0], [1], [0, 0, 1, 1], [], []>} : vector<8x108xf32>, vector<108x256xf32>, vector<8x256xf32> -> vector<8x256xf32>
    %c3 = arith.constant 3 : index
    %c0_38 = arith.constant 0 : index
    %c0_39 = arith.constant 0 : index
    %37 = vector.load %arg7[%c3, %c0_38, %c0_39] : memref<4x8x1xf32, #tpu.memory_space<vmem>>, vector<1x8x1xf32>
    %38 = vector.shape_cast %37 : vector<1x8x1xf32> to vector<8x1xf32>
    %39 = vector.broadcast %38 : vector<8x1xf32> to vector<8x256xf32>
    %40 = arith.addf %36, %39 : vector<8x256xf32>
    %cst_40 = arith.constant 0.000000e+00 : f32
    %41 = vector.broadcast %cst_40 : f32 to vector<8x256xf32>
    %42 = arith.maximumf %40, %41 : vector<8x256xf32>
    %43 = tpu.concatenate %9, %20, %31, %42 in 0 : vector<8x256xf32>, vector<8x256xf32>, vector<8x256xf32>, vector<8x256xf32> -> vector<32x256xf32>
    %c0_41 = arith.constant 0 : index
    %c0_42 = arith.constant 0 : index
    %44 = vector.load %arg6[%c0_41, %c0_42] : memref<8x32xf32, #tpu.memory_space<vmem>>, vector<8x32xf32>
    %cst_43 = arith.constant dense<0.000000e+00> : vector<8x256xf32>
    %45 = tpu.matmul %44, %43, %cst_43 {dimension_numbers = #tpu.dot_dimension_numbers<[1], [0], [0], [1], [0, 0, 1, 1], [], []>} : vector<8x32xf32>, vector<32x256xf32>, vector<8x256xf32> -> vector<8x256xf32>
    %c0_44 = arith.constant 0 : index
    %c0_45 = arith.constant 0 : index
    %c0_46 = arith.constant 0 : index
    %46 = vector.load %arg8[%c0_44, %c0_45, %c0_46] : memref<1x8x1xf32, #tpu.memory_space<vmem>>, vector<1x8x1xf32>
    %47 = vector.shape_cast %46 : vector<1x8x1xf32> to vector<8x1xf32>
    %48 = vector.broadcast %47 : vector<8x1xf32> to vector<8x256xf32>
    %49 = arith.addf %45, %48 : vector<8x256xf32>
    %cst_47 = arith.constant 0.000000e+00 : f32
    %50 = vector.broadcast %cst_47 : f32 to vector<8x256xf32>
    %51 = arith.maximumf %49, %50 : vector<8x256xf32>
    %c0_48 = arith.constant 0 : index
    %c0_49 = arith.constant 0 : index
    %c0_50 = arith.constant 0 : index
    %52 = vector.load %arg9[%c0_48, %c0_49, %c0_50] : memref<1x8x256xf32, #tpu.memory_space<vmem>>, vector<1x8x256xf32>
    %53 = vector.shape_cast %52 : vector<1x8x256xf32> to vector<8x256xf32>
    %54 = vector.shape_cast %51 : vector<8x256xf32> to vector<1x8x256xf32>
    tpu.vector_store %arg9[%c0_48, %c0_49, %c0_50], %54 {strides = array<i32>} : memref<1x8x256xf32, #tpu.memory_space<vmem>>, vector<1x8x256xf32>,
    return
  }
  func.func @transform_0(%arg0: i32, %arg1: i32) -> (i32, i32, i32) {
    %c0_i32 = arith.constant 0 : i32
    %c0_i32_0 = arith.constant 0 : i32
    return %arg0, %c0_i32, %arg1 : i32, i32, i32
  }
  func.func @transform_1(%arg0: i32, %arg1: i32) -> (i32, i32, i32, i32) {
    %c0_i32 = arith.constant 0 : i32
    %c0_i32_0 = arith.constant 0 : i32
    %c0_i32_1 = arith.constant 0 : i32
    return %arg0, %c0_i32, %c0_i32_0, %arg1 : i32, i32, i32, i32
  }
  func.func @transform_2(%arg0: i32, %arg1: i32) -> (i32, i32) {
    %c0_i32 = arith.constant 0 : i32
    %c0_i32_0 = arith.constant 0 : i32
    %c0_i32_1 = arith.constant 0 : i32
    return %c0_i32, %c0_i32_0 : i32, i32
  }
  func.func @transform_3(%arg0: i32, %arg1: i32) -> (i32, i32, i32) {
    %c0_i32 = arith.constant 0 : i32
    %c0_i32_0 = arith.constant 0 : i32
    %c0_i32_1 = arith.constant 0 : i32
    %c0_i32_2 = arith.constant 0 : i32
    return %c0_i32, %c0_i32_0, %c0_i32_1 : i32, i32, i32
  }
  func.func @transform_4(%arg0: i32, %arg1: i32) -> (i32, i32) {
    %c0_i32 = arith.constant 0 : i32
    %c0_i32_0 = arith.constant 0 : i32
    %c0_i32_1 = arith.constant 0 : i32
    return %c0_i32, %c0_i32_0 : i32, i32
  }
  func.func @transform_5(%arg0: i32, %arg1: i32) -> (i32, i32, i32) {
    %c0_i32 = arith.constant 0 : i32
    %c0_i32_0 = arith.constant 0 : i32
    %c0_i32_1 = arith.constant 0 : i32
    %c0_i32_2 = arith.constant 0 : i32
    return %c0_i32, %c0_i32_0, %c0_i32_1 : i32, i32, i32
  }
  func.func @transform_6(%arg0: i32, %arg1: i32) -> (i32, i32, i32) {
    %c0_i32 = arith.constant 0 : i32
    %c0_i32_0 = arith.constant 0 : i32
    %c0_i32_1 = arith.constant 0 : i32
    return %arg0, %c0_i32, %c0_i32_0 : i32, i32, i32
  }
  func.func @transform_7(%arg0: i32, %arg1: i32) -> (i32, i32, i32) {
    %c0_i32 = arith.constant 0 : i32
    %c0_i32_0 = arith.constant 0 : i32
    return %arg0, %c0_i32, %arg1 : i32, i32, i32
  }
}

</mosaic_0001>

<bundles_post_ra>
// kernel: tpu_custom_call.1
= control target key start
LH: loop header
LB: loop body
LE: loop exit
PB: predicated region body
PF: predicated region fallthrough
CT: control target
= control target key end

     0   :  { %12 = vsyncpa [#allocation4], 0  ;;  %s2095_s0 = inlined_call_operand.vmem [shape: f32[2,4,512], index: 0, kind: input, shape index: {}]   ;;  %s2096_s1 = inlined_call_operand.vmem [shape: f32[2,3,108,512], index: 1, kind: input, shape index: {}]   ;;  %s2097_s2 = inlined_call_operand.vmem [shape: f32[8,4], index: 2, kind: input, shape index: {}]   ;;  %s2098_s3 = inlined_call_operand.vmem [shape: f32[3,8,108], index: 3, kind: input, shape index: {}]   ;;  %s2099_s4 = inlined_call_operand.vmem [shape: f32[8,32], index: 4, kind: input, shape index: {}]   ;;  %s2100_s5 = inlined_call_operand.vmem [shape: f32[4,8,1], index: 5, kind: input, shape index: {}]   ;;  %s2101_s6 = inlined_call_operand.vmem [shape: f32[2,8,1], index: 6, kind: input, shape index: {}]   ;;  %s2102_s7 = inlined_call_operand.hbm [shape: f32[2,8,512], index: 7, kind: output, shape index: {}]  }
   0x1   :  { %14 = vsyncpa [#allocation4 + $0x1], 0  ;;  %s1612_s24 = smov 0   ;;  %s1614_s25 = smov 0  }
   0x2   :  { %s1616_s26 = smov 0   ;;  %s1618_s27 = smov 0  }
   0x3   :  { %s1620_s28 = smov 0   ;;  %s1622_s29 = smov 0  }
   0x4   :  { %s1624_s30 = smov 0   ;;  %s1626_s8 = smov 0  }
   0x5 LB: > { %s1202_s9 = sadd.s32 4294967295, %s1566_s8   ;;  %s1203_s10 = sadd.s32 4294967294, %s1566_s8   ;;  %s1566_s8 = sphi %s1626_s8, %s20_s8   ;;  %s1562_s30 = sphi %s1624_s30, %s2117_s30   ;;  %s1558_s29 = sphi %s1622_s29, %s2116_s29   ;;  %s1554_s28 = sphi %s1620_s28, %s2115_s28   ;;  %s1550_s27 = sphi %s1618_s27, %s2114_s27   ;;  %s1546_s26 = sphi %s1616_s26, %s2113_s26   ;;  %s1542_s25 = sphi %s1614_s25, %s2112_s25   ;;  %s1538_s24 = sphi %s1612_s24, %s2111_s24  }
   0x6   : > { %s29_s11 = sadd.s32 1, %s1558_s29  ;;  %s32_s12 = sadd.s32 1, %s1562_s30 }
   0x7   : > { %p30_p0 = scmp.ge.s32.totalorder %s29_s11, 2  ;;  %p76_p1 = scmp.ne.s32.totalorder %s1546_s26, %s1542_s25 }
   0x8   : > { %p77_p2 = scmp.eq.s32.totalorder %s1566_s8, 0  ;;  %p218_p5 = scmp.eq.s32.totalorder %s1202_s9, 3 }
   0x9   : > { %s2119_s11 = smov (%p30_p0, %s29_s11), 0  ;;  %s2121_s12 = smov (!%p30_p0, %s32_s12), %s1562_s30 }
   0xa   : > { %s65_s13 = ssub.s32 %s1558_s29, %s2119_s11  ;;  %p1664_p3 = por %p77_p2, %p76_p1 }
   0xb   : > { %p34_p4 = scmp.ge.s32.totalorder %s2121_s12, 2  ;;  %p223_p6 = scmp.ne.s32.totalorder %s1542_s25, %s1538_s24 }
   0xc   : > { %p224_p7 = scmp.eq.s32.totalorder %s1203_s10, 3  ;;  %p1672_p8 = por %p218_p5, %p76_p1 }
   0xd   : > { %s2123_s12 = smov (%p34_p4, %s2121_s12), 0  ;;  %s69_s19 = sadd.s32 1, %s1546_s26 }
   0xe   : > { %2105 = sst [smem:[#allocation6_spill]] %s2123_s12  ;;  %p1676_p9 = por %p224_p7, %p223_p6 }
   0xf   : > { %s64_s17 = ssub.s32 %s1562_s30, %s2123_s12  ;;  %p1205_p11 = scmp.ge.s32.totalorder %s1566_s8, 4 }
  0x10   : > { %s66_s18 = sor.u32 %s65_s13, %s64_s17 }
  0x11   : > { %p67_p10 = scmp.eq.s32.totalorder %s66_s18, 0  ;;  %252 = sbr.rel (%p1205_p11) target bundleno = 74 (0x4a), region = 32 }
  0x13   : > { %s1684_s20 = scalar_select %p67_p10, %s1546_s26, %s69_s19  }
  0x18   : > { %268 = sbr.rel (!%p1664_p3) target bundleno = 74 (0x4a), region = 40  ;;  %s270_s21 = sand.u32 (%p1664_p3), 1, %s1546_s26  }
  0x19   : > { %s1392_s22 = smul.u32 (%p1664_p3), 672, %s270_s21  ;;  %s1206_s23 = sshll.u32 (%p1664_p3), %s1558_s29, 1 }
  0x1a   : > { %s1393_s9 = smul.u32 (%p1664_p3), 168, %s1562_s30 }
  0x1b   : > { %s1700_s14 = scalar_lea.vmem (%p1664_p3), [#allocation2], %s1392_s22 }
  0x1c   : > { %s275_s10 = sadd.s32 (%p1664_p3), %s1393_s9, %s1206_s23 }
  0x1d   : > { %s1207_s12 = sshll.u32 (%p1664_p3), %s275_s10, 3 }
  0x1e   : > { %s1695_s18 = scalar_lea.vmem (%p1664_p3), %s2096_s1, %s1207_s12 }
  0x1f   : > { %v290_v0 = vld [vmem:[%s1695_s18] sm:$0xff]  ;;  %v292_v1 = vld [vmem:[%s1695_s18 + $0x8] sm:$0xff] }
  0x20   : > { %v294_v2 = vld [vmem:[%s1695_s18 + $0x20] sm:$0xff]  ;;  %291 = vst [vmem:[%s1700_s14] sm:$0xff] %v290_v0  ;;  %293 = vst [vmem:[%s1700_s14 + $0x8] sm:$0xff] %v292_v1  ;;  %v296_v3 = vld [vmem:[%s1695_s18 + $0x28] sm:$0xff] }
  0x21   : > { %295 = vst [vmem:[%s1700_s14 + $0x10] sm:$0xff] %v294_v2  ;;  %v298_v4 = vld [vmem:[%s1695_s18 + $0x40] sm:$0xff]  ;;  %v300_v5 = vld [vmem:[%s1695_s18 + $0x48] sm:$0xff]  ;;  %297 = vst [vmem:[%s1700_s14 + $0x18] sm:$0xff] %v296_v3 }
  0x22   : > { %299 = vst [vmem:[%s1700_s14 + $0x20] sm:$0xff] %v298_v4  ;;  %301 = vst [vmem:[%s1700_s14 + $0x28] sm:$0xff] %v300_v5  ;;  %v302_v6 = vld [vmem:[%s1695_s18 + $0x60] sm:$0xff]  ;;  %v304_v7 = vld [vmem:[%s1695_s18 + $0x68] sm:$0xff] }
  0x23   : > { %v306_v8 = vld [vmem:[%s1695_s18 + $0x80] sm:$0xff]  ;;  %303 = vst [vmem:[%s1700_s14 + $0x30] sm:$0xff] %v302_v6  ;;  %305 = vst [vmem:[%s1700_s14 + $0x38] sm:$0xff] %v304_v7  ;;  %v308_v9 = vld [vmem:[%s1695_s18 + $0x88] sm:$0xff] }
  0x24   : > { %307 = vst [vmem:[%s1700_s14 + $0x40] sm:$0xff] %v306_v8  ;;  %v310_v10 = vld [vmem:[%s1695_s18 + $0xa0] sm:$0xff]  ;;  %v312_v11 = vld [vmem:[%s1695_s18 + $0xa8] sm:$0xff]  ;;  %309 = vst [vmem:[%s1700_s14 + $0x48] sm:$0xff] %v308_v9 }
  0x25   : > { %311 = vst [vmem:[%s1700_s14 + $0x50] sm:$0xff] %v310_v10  ;;  %313 = vst [vmem:[%s1700_s14 + $0x58] sm:$0xff] %v312_v11  ;;  %v314_v12 = vld [vmem:[%s1695_s18 + $0xc0] sm:$0xff]  ;;  %v316_v13 = vld [vmem:[%s1695_s18 + $0xc8] sm:$0xff] }
  0x26   : > { %v318_v14 = vld [vmem:[%s1695_s18 + $0xe0] sm:$0xff]  ;;  %315 = vst [vmem:[%s1700_s14 + $0x60] sm:$0xff] %v314_v12  ;;  %317 = vst [vmem:[%s1700_s14 + $0x68] sm:$0xff] %v316_v13  ;;  %v320_v15 = vld [vmem:[%s1695_s18 + $0xe8] sm:$0xff] }
  0x27   : > { %319 = vst [vmem:[%s1700_s14 + $0x70] sm:$0xff] %v318_v14  ;;  %v322_v16 = vld [vmem:[%s1695_s18 + $0x100] sm:$0xff]  ;;  %v324_v17 = vld [vmem:[%s1695_s18 + $0x108] sm:$0xff]  ;;  %321 = vst [vmem:[%s1700_s14 + $0x78] sm:$0xff] %v320_v15 }
  0x28   : > { %323 = vst [vmem:[%s1700_s14 + $0x80] sm:$0xff] %v322_v16  ;;  %325 = vst [vmem:[%s1700_s14 + $0x88] sm:$0xff] %v324_v17  ;;  %v326_v18 = vld [vmem:[%s1695_s18 + $0x120] sm:$0xff]  ;;  %v328_v19 = vld [vmem:[%s1695_s18 + $0x128] sm:$0xff] }
  0x29   : > { %v330_v20 = vld [vmem:[%s1695_s18 + $0x140] sm:$0xff]  ;;  %327 = vst [vmem:[%s1700_s14 + $0x90] sm:$0xff] %v326_v18  ;;  %329 = vst [vmem:[%s1700_s14 + $0x98] sm:$0xff] %v328_v19  ;;  %v332_v21 = vld [vmem:[%s1695_s18 + $0x148] sm:$0xff] }
  0x2a   : > { %331 = vst [vmem:[%s1700_s14 + $0xa0] sm:$0xff] %v330_v20  ;;  %v334_v22 = vld [vmem:[%s1695_s18 + $0x160] sm:$0xff]  ;;  %v336_v23 = vld [vmem:[%s1695_s18 + $0x168] sm:$0xff]  ;;  %333 = vst [vmem:[%s1700_s14 + $0xa8] sm:$0xff] %v332_v21 }
  0x2b   : > { %335 = vst [vmem:[%s1700_s14 + $0xb0] sm:$0xff] %v334_v22  ;;  %337 = vst [vmem:[%s1700_s14 + $0xb8] sm:$0xff] %v336_v23  ;;  %v338_v24 = vld [vmem:[%s1695_s18 + $0x180] sm:$0xff]  ;;  %v340_v25 = vld [vmem:[%s1695_s18 + $0x188] sm:$0xff] }
  0x2c   : > { %v342_v26 = vld [vmem:[%s1695_s18 + $0x1a0] sm:$0xff]  ;;  %339 = vst [vmem:[%s1700_s14 + $0xc0] sm:$0xff] %v338_v24  ;;  %341 = vst [vmem:[%s1700_s14 + $0xc8] sm:$0xff] %v340_v25  ;;  %v344_v27 = vld [vmem:[%s1695_s18 + $0x1a8] sm:$0xff] }
  0x2d   : > { %343 = vst [vmem:[%s1700_s14 + $0xd0] sm:$0xff] %v342_v26  ;;  %v346_v28 = vld [vmem:[%s1695_s18 + $0x1c0] sm:$0xff]  ;;  %v348_v29 = vld [vmem:[%s1695_s18 + $0x1c8] sm:$0xff]  ;;  %345 = vst [vmem:[%s1700_s14 + $0xd8] sm:$0xff] %v344_v27 }
  0x2e   : > { %347 = vst [vmem:[%s1700_s14 + $0xe0] sm:$0xff] %v346_v28  ;;  %349 = vst [vmem:[%s1700_s14 + $0xe8] sm:$0xff] %v348_v29  ;;  %v350_v30 = vld [vmem:[%s1695_s18 + $0x1e0] sm:$0xff]  ;;  %v352_v31 = vld [vmem:[%s1695_s18 + $0x1e8] sm:$0xff] }
  0x2f   : > { %v354_v32 = vld [vmem:[%s1695_s18 + $0x200] sm:$0xff]  ;;  %351 = vst [vmem:[%s1700_s14 + $0xf0] sm:$0xff] %v350_v30  ;;  %353 = vst [vmem:[%s1700_s14 + $0xf8] sm:$0xff] %v352_v31  ;;  %v356_v33 = vld [vmem:[%s1695_s18 + $0x208] sm:$0xff] }
  0x30   : > { %355 = vst [vmem:[%s1700_s14 + $0x100] sm:$0xff] %v354_v32  ;;  %v358_v34 = vld [vmem:[%s1695_s18 + $0x220] sm:$0xff]  ;;  %v360_v35 = vld [vmem:[%s1695_s18 + $0x228] sm:$0xff]  ;;  %357 = vst [vmem:[%s1700_s14 + $0x108] sm:$0xff] %v356_v33 }
  0x31   : > { %359 = vst [vmem:[%s1700_s14 + $0x110] sm:$0xff] %v358_v34  ;;  %361 = vst [vmem:[%s1700_s14 + $0x118] sm:$0xff] %v360_v35  ;;  %v362_v36 = vld [vmem:[%s1695_s18 + $0x240] sm:$0xff]  ;;  %v364_v37 = vld [vmem:[%s1695_s18 + $0x248] sm:$0xff] }
  0x32   : > { %v366_v38 = vld [vmem:[%s1695_s18 + $0x260] sm:$0xff]  ;;  %363 = vst [vmem:[%s1700_s14 + $0x120] sm:$0xff] %v362_v36  ;;  %365 = vst [vmem:[%s1700_s14 + $0x128] sm:$0xff] %v364_v37  ;;  %v368_v39 = vld [vmem:[%s1695_s18 + $0x268] sm:$0xff] }
  0x33   : > { %367 = vst [vmem:[%s1700_s14 + $0x130] sm:$0xff] %v366_v38  ;;  %v370_v40 = vld [vmem:[%s1695_s18 + $0x280] sm:$0xff]  ;;  %v372_v41 = vld [vmem:[%s1695_s18 + $0x288] sm:$0xff]  ;;  %369 = vst [vmem:[%s1700_s14 + $0x138] sm:$0xff] %v368_v39 }
  0x34   : > { %371 = vst [vmem:[%s1700_s14 + $0x140] sm:$0xff] %v370_v40  ;;  %373 = vst [vmem:[%s1700_s14 + $0x148] sm:$0xff] %v372_v41  ;;  %v374_v42 = vld [vmem:[%s1695_s18 + $0x2a0] sm:$0xff]  ;;  %v376_v43 = vld [vmem:[%s1695_s18 + $0x2a8] sm:$0xff] }
  0x35   : > { %v378_v44 = vld [vmem:[%s1695_s18 + $0x2c0] sm:$0xff]  ;;  %375 = vst [vmem:[%s1700_s14 + $0x150] sm:$0xff] %v374_v42  ;;  %377 = vst [vmem:[%s1700_s14 + $0x158] sm:$0xff] %v376_v43  ;;  %v380_v45 = vld [vmem:[%s1695_s18 + $0x2c8] sm:$0xff] }
  0x36   : > { %379 = vst [vmem:[%s1700_s14 + $0x160] sm:$0xff] %v378_v44  ;;  %v382_v46 = vld [vmem:[%s1695_s18 + $0x2e0] sm:$0xff]  ;;  %v384_v47 = vld [vmem:[%s1695_s18 + $0x2e8] sm:$0xff]  ;;  %381 = vst [vmem:[%s1700_s14 + $0x168] sm:$0xff] %v380_v45 }
  0x37   : > { %383 = vst [vmem:[%s1700_s14 + $0x170] sm:$0xff] %v382_v46  ;;  %385 = vst [vmem:[%s1700_s14 + $0x178] sm:$0xff] %v384_v47  ;;  %v386_v48 = vld [vmem:[%s1695_s18 + $0x300] sm:$0xff]  ;;  %v388_v49 = vld [vmem:[%s1695_s18 + $0x308] sm:$0xff] }
  0x38   : > { %v390_v50 = vld [vmem:[%s1695_s18 + $0x320] sm:$0xff]  ;;  %387 = vst [vmem:[%s1700_s14 + $0x180] sm:$0xff] %v386_v48  ;;  %389 = vst [vmem:[%s1700_s14 + $0x188] sm:$0xff] %v388_v49  ;;  %v392_v51 = vld [vmem:[%s1695_s18 + $0x328] sm:$0xff] }
  0x39   : > { %391 = vst [vmem:[%s1700_s14 + $0x190] sm:$0xff] %v390_v50  ;;  %v394_v52 = vld [vmem:[%s1695_s18 + $0x340] sm:$0xff]  ;;  %v396_v53 = vld [vmem:[%s1695_s18 + $0x348] sm:$0xff]  ;;  %393 = vst [vmem:[%s1700_s14 + $0x198] sm:$0xff] %v392_v51 }
  0x3a   : > { %395 = vst [vmem:[%s1700_s14 + $0x1a0] sm:$0xff] %v394_v52  ;;  %397 = vst [vmem:[%s1700_s14 + $0x1a8] sm:$0xff] %v396_v53  ;;  %v398_v54 = vld [vmem:[%s1695_s18 + $0x360] sm:$0xff]  ;;  %v400_v55 = vld [vmem:[%s1695_s18 + $0x368] sm:$0xff] }
  0x3b   : > { %v402_v56 = vld [vmem:[%s1695_s18 + $0x380] sm:$0xff]  ;;  %399 = vst [vmem:[%s1700_s14 + $0x1b0] sm:$0xff] %v398_v54  ;;  %401 = vst [vmem:[%s1700_s14 + $0x1b8] sm:$0xff] %v400_v55  ;;  %v404_v57 = vld [vmem:[%s1695_s18 + $0x388] sm:$0xff] }
  0x3c   : > { %403 = vst [vmem:[%s1700_s14 + $0x1c0] sm:$0xff] %v402_v56  ;;  %v406_v58 = vld [vmem:[%s1695_s18 + $0x3a0] sm:$0xff]  ;;  %v408_v59 = vld [vmem:[%s1695_s18 + $0x3a8] sm:$0xff]  ;;  %405 = vst [vmem:[%s1700_s14 + $0x1c8] sm:$0xff] %v404_v57 }
  0x3d   : > { %407 = vst [vmem:[%s1700_s14 + $0x1d0] sm:$0xff] %v406_v58  ;;  %409 = vst [vmem:[%s1700_s14 + $0x1d8] sm:$0xff] %v408_v59  ;;  %v410_v60 = vld [vmem:[%s1695_s18 + $0x3c0] sm:$0xff]  ;;  %v412_v61 = vld [vmem:[%s1695_s18 + $0x3c8] sm:$0xff] }
  0x3e   : > { %v414_v62 = vld [vmem:[%s1695_s18 + $0x3e0] sm:$0xff]  ;;  %411 = vst [vmem:[%s1700_s14 + $0x1e0] sm:$0xff] %v410_v60  ;;  %413 = vst [vmem:[%s1700_s14 + $0x1e8] sm:$0xff] %v412_v61  ;;  %v416_v63 = vld [vmem:[%s1695_s18 + $0x3e8] sm:$0xff] }
  0x3f   : > { %415 = vst [vmem:[%s1700_s14 + $0x1f0] sm:$0xff] %v414_v62  ;;  %v418_v0 = vld [vmem:[%s1695_s18 + $0x400] sm:$0xff]  ;;  %v420_v1 = vld [vmem:[%s1695_s18 + $0x408] sm:$0xff]  ;;  %417 = vst [vmem:[%s1700_s14 + $0x1f8] sm:$0xff] %v416_v63 }
  0x40   : > { %419 = vst [vmem:[%s1700_s14 + $0x200] sm:$0xff] %v418_v0  ;;  %421 = vst [vmem:[%s1700_s14 + $0x208] sm:$0xff] %v420_v1  ;;  %v422_v2 = vld [vmem:[%s1695_s18 + $0x420] sm:$0xff]  ;;  %v424_v3 = vld [vmem:[%s1695_s18 + $0x428] sm:$0xff] }
  0x41   : > { %v426_v4 = vld [vmem:[%s1695_s18 + $0x440] sm:$0xff]  ;;  %423 = vst [vmem:[%s1700_s14 + $0x210] sm:$0xff] %v422_v2  ;;  %425 = vst [vmem:[%s1700_s14 + $0x218] sm:$0xff] %v424_v3  ;;  %v428_v5 = vld [vmem:[%s1695_s18 + $0x448] sm:$0xff] }
  0x42   : > { %427 = vst [vmem:[%s1700_s14 + $0x220] sm:$0xff] %v426_v4  ;;  %v430_v6 = vld [vmem:[%s1695_s18 + $0x460] sm:$0xff]  ;;  %v432_v7 = vld [vmem:[%s1695_s18 + $0x468] sm:$0xff]  ;;  %429 = vst [vmem:[%s1700_s14 + $0x228] sm:$0xff] %v428_v5 }
  0x43   : > { %431 = vst [vmem:[%s1700_s14 + $0x230] sm:$0xff] %v430_v6  ;;  %433 = vst [vmem:[%s1700_s14 + $0x238] sm:$0xff] %v432_v7  ;;  %v434_v8 = vld [vmem:[%s1695_s18 + $0x480] sm:$0xff]  ;;  %v436_v9 = vld [vmem:[%s1695_s18 + $0x488] sm:$0xff] }
  0x44   : > { %v438_v10 = vld [vmem:[%s1695_s18 + $0x4a0] sm:$0xff]  ;;  %435 = vst [vmem:[%s1700_s14 + $0x240] sm:$0xff] %v434_v8  ;;  %437 = vst [vmem:[%s1700_s14 + $0x248] sm:$0xff] %v436_v9  ;;  %v440_v11 = vld [vmem:[%s1695_s18 + $0x4a8] sm:$0xff] }
  0x45   : > { %439 = vst [vmem:[%s1700_s14 + $0x250] sm:$0xff] %v438_v10  ;;  %v442_v12 = vld [vmem:[%s1695_s18 + $0x4c0] sm:$0xff]  ;;  %v444_v13 = vld [vmem:[%s1695_s18 + $0x4c8] sm:$0xff]  ;;  %441 = vst [vmem:[%s1700_s14 + $0x258] sm:$0xff] %v440_v11 }
  0x46   : > { %443 = vst [vmem:[%s1700_s14 + $0x260] sm:$0xff] %v442_v12  ;;  %445 = vst [vmem:[%s1700_s14 + $0x268] sm:$0xff] %v444_v13  ;;  %v446_v14 = vld [vmem:[%s1695_s18 + $0x4e0] sm:$0xff]  ;;  %v448_v15 = vld [vmem:[%s1695_s18 + $0x4e8] sm:$0xff] }
  0x47   : > { %v450_v16 = vld [vmem:[%s1695_s18 + $0x500] sm:$0xff]  ;;  %447 = vst [vmem:[%s1700_s14 + $0x270] sm:$0xff] %v446_v14  ;;  %449 = vst [vmem:[%s1700_s14 + $0x278] sm:$0xff] %v448_v15  ;;  %v452_v17 = vld [vmem:[%s1695_s18 + $0x508] sm:$0xff] }
  0x48   : > { %451 = vst [vmem:[%s1700_s14 + $0x280] sm:$0xff] %v450_v16  ;;  %v454_v18 = vld [vmem:[%s1695_s18 + $0x520] sm:$0xff]  ;;  %v456_v19 = vld [vmem:[%s1695_s18 + $0x528] sm:$0xff]  ;;  %453 = vst [vmem:[%s1700_s14 + $0x288] sm:$0xff] %v452_v17 }
  0x49   : > { %455 = vst [vmem:[%s1700_s14 + $0x290] sm:$0xff] %v454_v18  ;;  %457 = vst [vmem:[%s1700_s14 + $0x298] sm:$0xff] %v456_v19 }
  0x4a PF: > { %p1208_p12 = scmp.ge.s32.totalorder %s1566_s8, 1  ;;  %p469_p13 = scmp.lt.s32.totalorder %s1566_s8, 5 }
  0x4c   : > { %p470_p0 = pnand %p1208_p12, %p469_p13 }
  0x4d   : > { %s1870_s12 = sand.u32 (!%p470_p0), 1, %s1542_s25   ;;  %s1873_s19 = sshll.u32 (!%p470_p0), %s1550_s27, 1  ;;  %v1568_v20 = vmov (!%p470_p0), 0.0   ;;  %v538_v21 = vld [vmem:[%s2100_s5] sm:$0xff] (!%p470_p0)  ;;  %v1569_v22 = vmov (!%p470_p0), 0   ;;  %v1217_v23 = vld [vmem:[%s2100_s5 + $0x8] sm:$0xff] (!%p470_p0) }
  0x4e   : > { %473 = sbr.rel (%p470_p0) target bundleno = 595 (0x253), region = 67  ;;  %p521_p1 = scmp.lt.s32.totalorder (!%p470_p0), %s1554_s28, 1  ;;  %619 = vmatprep.mubr.f32.mxu0 (!%p470_p0), %v1568_v20  ;;  %738 = vmatprep.mubr.f32.mxu1 (!%p470_p0), %v1568_v20  ;;  %v1250_v24 = vld [vmem:[%s2100_s5 + $0x10] sm:$0xff] (!%p470_p0)  ;;  %v1283_v28 = vld [vmem:[%s2100_s5 + $0x18] sm:$0xff] (!%p470_p0)  ;;  %vm550_vm0 = vcmask (!%p470_p0), 1043456   ;;  %v536_v58 = vld [vmem:[%s2097_s2] sm:$0xff] (!%p470_p0) }
  0x4f   : > { %s1394_s21 = smul.u32 (!%p470_p0), 672, %s1870_s12  ;;  %p523_p2 = scmp.lt.s32.totalorder (!%p470_p0), %s1873_s19, 3  ;;  %1469 = vset.pattern.permute.xlu0 (!%p470_p0), %v1569_v22  ;;  %1470 = vset.pattern.permute.xlu1 (!%p470_p0), %v1569_v22  ;;  %vm546_vm1 = vcmask (!%p470_p0), 31744   ;;  %vm1570_vm2 = vmmov (!%p470_p0), 1   ;;  %vm664_vm4 = vcmask (!%p470_p0), 883712   ;;  %vm994_vm5 = vcmask (!%p470_p0), 261120  }
  0x50   : > { %541 = vperm.xlu0 (!%p470_p0), %1469, %v538_v21   ;;  %782 = vperm.xlu1 (!%p470_p0), %1470, %v1250_v24   ;;  %vm1960_vm3 = vmpackc.low (!%p470_p0), %vm550_vm0, %vm1570_vm2 }
  0x51   : > { %s1889_s17 = scalar_lea.vmem (!%p470_p0), [#allocation2], %s1394_s21 }
  0x52   : > { %v630_v25 = vld [vmem:[%s1889_s17 + $0x8] sm:$0xff] (!%p470_p0)  ;;  %v632_v26 = vld [vmem:[%s1889_s17 + $0x18] sm:$0xff] (!%p470_p0)  ;;  %v629_v27 = vld [vmem:[%s1889_s17] sm:$0xff] (!%p470_p0) }
  0x53   : > { %v1294_v29 = vpack.c.bf16 (!%p470_p0), %v632_v26, %v630_v25  ;;  %v631_v30 = vld [vmem:[%s1889_s17 + $0x10] sm:$0xff] (!%p470_p0)  ;;  %v634_v31 = vld [vmem:[%s1889_s17 + $0x28] sm:$0xff] (!%p470_p0)  ;;  %v636_v32 = vld [vmem:[%s1889_s17 + $0x38] sm:$0xff] (!%p470_p0) }
  0x54   : > { %v1296_v33 = vpack.c.bf16 (!%p470_p0), %v631_v30, %v629_v27  ;;  %v1298_v34 = vpack.c.bf16 (!%p470_p0), %v636_v32, %v634_v31  ;;  %v633_v35 = vld [vmem:[%s1889_s17 + $0x20] sm:$0xff] (!%p470_p0)  ;;  %v635_v36 = vld [vmem:[%s1889_s17 + $0x30] sm:$0xff] (!%p470_p0)  ;;  %v638_v37 = vld [vmem:[%s1889_s17 + $0x48] sm:$0xff] (!%p470_p0)  ;;  %661 = vperm.xlu0 (!%p470_p0), %1469, %v1217_v23   ;;  %902 = vperm.xlu1 (!%p470_p0), %1470, %v1283_v28  }
  0x55   : > { %s1897_s18 = scalar_select %p521_p1, %s1554_s28, 1  ;;  %1295 = vmatprep.subr.bf16.mxu1 %v1294_v29  ;;  %v640_v38 = vld [vmem:[%s1889_s17 + $0x58] sm:$0xff]  ;;  %v1300_v39 = vpack.c.bf16 %v635_v36, %v633_v35  ;;  %v637_v41 = vld [vmem:[%s1889_s17 + $0x40] sm:$0xff]  ;;  %v639_v42 = vld [vmem:[%s1889_s17 + $0x50] sm:$0xff] }
  0x56   : > { %s524_s22 = scalar_select %p523_p2, %s1873_s19, 3  ;;  %1297 = vmatpush1.bf16.msra.mxu1 %v1296_v33  ;;  %v1302_v40 = vpack.c.bf16 %v640_v38, %v638_v37  ;;  %v642_v43 = vld [vmem:[%s1889_s17 + $0x68] sm:$0xff]  ;;  %v644_v44 = vld [vmem:[%s1889_s17 + $0x78] sm:$0xff]  ;;  %v1304_v45 = vpack.c.bf16 %v639_v42, %v637_v41  ;;  %v641_v46 = vld [vmem:[%s1889_s17 + $0x60] sm:$0xff] }
  0x57   : > { %s1211_s23 = sshll.u32 %s1897_s18, 2  ;;  %1299 = vmatprep.subr.bf16.mxu1 %v1298_v34  ;;  %v643_v47 = vld [vmem:[%s1889_s17 + $0x70] sm:$0xff]  ;;  %v1306_v49 = vpack.c.bf16 %v644_v44, %v642_v43  ;;  %v646_v50 = vld [vmem:[%s1889_s17 + $0x88] sm:$0xff]  ;;  %v1225_v53 = vld [vmem:[%s1889_s17 + $0xf8] sm:$0xff] }
  0x58   : > { %s526_s9 = sadd.s32 %s1211_s23, %s524_s22  ;;  %v1223_v52 = vld [vmem:[%s1889_s17 + $0xe8] sm:$0xff]  ;;  %v648_v54 = vld [vmem:[%s1889_s17 + $0x98] sm:$0xff]  ;;  %v1222_v56 = vld [vmem:[%s1889_s17 + $0xe0] sm:$0xff]  ;;  %v1308_v62 = vpack.c.bf16 %v643_v47, %v641_v46  ;;  %s1213_s23 = sshll.u32 %s1897_s18, 3 }
  0x59   : > { %s1212_s27 = sshll.u32 %s526_s9, 2  ;;  %v1324_v55 = vpack.c.bf16 %v1225_v53, %v1223_v52  ;;  %v1224_v57 = vld [vmem:[%s1889_s17 + $0xf0] sm:$0xff]  ;;  %v1227_v60 = vld [vmem:[%s1889_s17 + $0x108] sm:$0xff]  ;;  %v1229_v61 = vld [vmem:[%s1889_s17 + $0x118] sm:$0xff]  ;;  %v1310_v2 = vpack.c.bf16 %v648_v54, %v646_v50  ;;  %s1209_s9 = sshll.u32 %s1870_s12, 4 }
  0x5a   : > { %s528_s14 = scalar_lea.vmem %s2095_s0, %s1212_s27  ;;  %1301 = vmatpush1.bf16.msra.mxu1 %v1300_v39  ;;  %v1326_v59 = vpack.c.bf16 %v1224_v57, %v1222_v56  ;;  %v1328_v63 = vpack.c.bf16 %v1229_v61, %v1227_v60  ;;  %v1226_v0 = vld [vmem:[%s1889_s17 + $0x100] sm:$0xff]  ;;  %v1228_v1 = vld [vmem:[%s1889_s17 + $0x110] sm:$0xff]  ;;  %v1231_v5 = vld [vmem:[%s1889_s17 + $0x128] sm:$0xff]  ;;  %s534_s27 = scalar_lea.vmem %s2101_s6, %s1213_s23 }
  0x5b   : > { %v537_v48 = vld [vmem:[%s528_s14] sm:$0xff]  ;;  %1303 = vmatprep.subr.bf16.mxu1 %v1302_v40  ;;  %v647_v4 = vld [vmem:[%s1889_s17 + $0x90] sm:$0xff]  ;;  %v650_v6 = vld [vmem:[%s1889_s17 + $0xa8] sm:$0xff]  ;;  %v1330_v9 = vpack.c.bf16 %v1228_v1, %v1226_v0  ;;  %s519_s14 = scalar_lea.vmem [#allocation3], %s1209_s9  ;;  %s1571_s18 = smov [#allocation3]  }
  0x5c   : > { %v545_v51 = vcombine.high %v537_v48, %v537_v48  ;;  %v645_v3 = vld [vmem:[%s1889_s17 + $0x80] sm:$0xff]  ;;  %v652_v7 = vld [vmem:[%s1889_s17 + $0xb8] sm:$0xff]  ;;  %v1232_v14 = vld [vmem:[%s1889_s17 + $0x130] sm:$0xff]  ;;  %s1090_s21 = sshll.u32 %s519_s14, 4  ;;  %s1476_s9 = sshll.u32 %s1571_s18, 4  ;;  %s2043_s21 = int_to_ptr.vmem [resolvable:$true] %s1090_s21  ;;  %s1477_s9 = int_to_ptr.vmem [resolvable:$false] %s1476_s9 }
  0x5d   : > { %v1233_v8 = vld [vmem:[%s1889_s17 + $0x138] sm:$0xff]  ;;  %v1312_v10 = vpack.c.bf16 %v647_v4, %v645_v3  ;;  %v649_v11 = vld [vmem:[%s1889_s17 + $0xa0] sm:$0xff]  ;;  %v1314_v15 = vpack.c.bf16 %v652_v7, %v650_v6  ;;  %v651_v16 = vld [vmem:[%s1889_s17 + $0xb0] sm:$0xff]  ;;  %p1479_p6 = scmp.lt.s32.totalorder %s2043_s21, %s1477_s9 }
  0x5e   : > { %1214 = vmatprep.subr.msk.mxu0 %vm550_vm0, %v545_v51  ;;  %1305 = vmatpush1.bf16.msra.mxu1 %v1304_v45  ;;  %v1332_v12 = vpack.c.bf16 %v1233_v8, %v1231_v5  ;;  %v1230_v13 = vld [vmem:[%s1889_s17 + $0x120] sm:$0xff]  ;;  %v1235_v17 = vld [vmem:[%s1889_s17 + $0x148] sm:$0xff]  ;;  %v1237_v18 = vld [vmem:[%s1889_s17 + $0x158] sm:$0xff]  ;;  %v1316_v23 = vpack.c.bf16 %v651_v16, %v649_v11 }
  0x5f   : > { %1215 = vmatpush1.msk.msra.mxu0 %vm550_vm0, %v537_v48  ;;  %1307 = vmatprep.subr.bf16.mxu1 %v1306_v49  ;;  %v654_v19 = vld [vmem:[%s1889_s17 + $0xc8] sm:$0xff]  ;;  %v656_v21 = vld [vmem:[%s1889_s17 + $0xd8] sm:$0xf]  ;;  %v1334_v22 = vpack.c.bf16 %v1232_v14, %v1230_v13  ;;  %v653_v24 = vld [vmem:[%s1889_s17 + $0xc0] sm:$0xff]  ;;  %v1336_v25 = vpack.c.bf16 %v1237_v18, %v1235_v17 }
  0x60   : > { %1325 = vmatprep.subr.bf16.mxu0 %v1324_v55  ;;  %1216 = vmatmul.mubr.msk.f32.vlgmr.msra.gmra.mrb[0].mxu0 %vm546_vm1, %v536_v58  ;;  %v1234_v26 = vld [vmem:[%s1889_s17 + $0x140] sm:$0xff]  ;;  %v1236_v27 = vld [vmem:[%s1889_s17 + $0x150] sm:$0xff]  ;;  %v1318_v28 = vpack.c.bf16 %v656_v21, %v654_v19  ;;  %v1239_v30 = vld [vmem:[%s1889_s17 + $0x168] sm:$0xff] }
  0x61   : > { %1327 = vmatpush1.bf16.msra.mxu0 %v1326_v59  ;;  %858 = vmatprep.mubr.f32.mxu0 %v1568_v20  ;;  %v655_v29 = vld [vmem:[%s1889_s17 + $0xd0] sm:$0xf]  ;;  %v1241_v31 = vld [vmem:[%s1889_s17 + $0x178] sm:$0xff]  ;;  %v1256_v33 = vld [vmem:[%s1889_s17 + $0x1c8] sm:$0xff]  ;;  %v1338_v35 = vpack.c.bf16 %v1236_v27, %v1234_v26 }
  0x62   : > { %1309 = vmatpush1.bf16.msra.mxu1 %v1308_v62  ;;  %1329 = vmatprep.subr.bf16.mxu0 %v1328_v63  ;;  %v1258_v34 = vld [vmem:[%s1889_s17 + $0x1d8] sm:$0xff]  ;;  %v1321_v36 = vpack.c.bf16 %v655_v29, %v653_v24  ;;  %v1255_v37 = vld [vmem:[%s1889_s17 + $0x1c0] sm:$0xff]  ;;  %v1340_v38 = vpack.c.bf16 %v1241_v31, %v1239_v30  ;;  %v1240_v40 = vld [vmem:[%s1889_s17 + $0x170] sm:$0xff] }
  0x63   : > { %1311 = vmatprep.subr.bf16.mxu1 %v1310_v2  ;;  %v1238_v39 = vld [vmem:[%s1889_s17 + $0x160] sm:$0xff]  ;;  %v1354_v41 = vpack.c.bf16 %v1258_v34, %v1256_v33  ;;  %v1257_v42 = vld [vmem:[%s1889_s17 + $0x1d0] sm:$0xff]  ;;  %v1243_v43 = vld [vmem:[%s1889_s17 + $0x188] sm:$0xff] }
  0x64   : > { %v1245_v44 = vld [vmem:[%s1889_s17 + $0x198] sm:$0xff]  ;;  %v1260_v45 = vld [vmem:[%s1889_s17 + $0x1e8] sm:$0xff]  ;;  %v628_v47 = vld [vmem:[%s2098_s3] sm:$0xff]  ;;  %v1342_v49 = vpack.c.bf16 %v1240_v40, %v1238_v39  ;;  %v1356_v50 = vpack.c.bf16 %v1257_v42, %v1255_v37 }
  0x65   : > { %1331 = vmatpush1.bf16.msra.mxu0 %v1330_v9  ;;  %v1262_v46 = vld [vmem:[%s1889_s17 + $0x1f8] sm:$0xff]  ;;  %v1259_v48 = vld [vmem:[%s1889_s17 + $0x1e0] sm:$0xff]  ;;  %v1344_v51 = vpack.c.bf16 %v1245_v44, %v1243_v43  ;;  %v1244_v53 = vld [vmem:[%s1889_s17 + $0x190] sm:$0xff] }
  0x66   : > { %1313 = vmatpush1.bf16.msra.mxu1 %v1312_v10  ;;  %1333 = vmatprep.subr.bf16.mxu0 %v1332_v12  ;;  %v1242_v52 = vld [vmem:[%s1889_s17 + $0x180] sm:$0xff]  ;;  %v1358_v55 = vpack.c.bf16 %v1262_v46, %v1260_v45  ;;  %v1261_v56 = vld [vmem:[%s1889_s17 + $0x1f0] sm:$0xff]  ;;  %v1247_v57 = vld [vmem:[%s1889_s17 + $0x1a8] sm:$0xff] }
  0x67   : > { %1315 = vmatprep.subr.bf16.mxu1 %v1314_v15  ;;  %v988_v54 = vld [vmem:[%s534_s27] sm:$0xff]  ;;  %v1249_v58 = vld [vmem:[%s1889_s17 + $0x1b8] sm:$0xf]  ;;  %v1264_v59 = vld [vmem:[%s1889_s17 + $0x208] sm:$0xff]  ;;  %v1346_v61 = vpack.c.bf16 %v1244_v53, %v1242_v52  ;;  %v1360_v62 = vpack.c.bf16 %v1261_v56, %v1259_v48  ;;  %s1290_s27 = sshll.u32 %s1554_s28, 2  ;;  %s1074_s28 = scalar_lea.sflag [#allocation4], %s1870_s12 }
  0x68   : > { %991 = vperm.xlu0 %1469, %v988_v54   ;;  %v1266_v60 = vld [vmem:[%s1889_s17 + $0x218] sm:$0xff]  ;;  %v1348_v63 = vpack.c.bf16 %v1249_v58, %v1247_v57  ;;  %v1246_v0 = vld [vmem:[%s1889_s17 + $0x1a0] sm:$0xff]  ;;  %v1248_v1 = vld [vmem:[%s1889_s17 + $0x1b0] sm:$0xf]  ;;  %s1086_s10 = sadd.s32 %s1290_s27, %s1873_s19  ;;  %s1472_s19 = scalar_lea.vmem %s2043_s21, 256 }
  0x69   : > { %1335 = vmatpush1.bf16.msra.mxu0 %v1334_v22  ;;  %v1362_v2 = vpack.c.bf16 %v1266_v60, %v1264_v59  ;;  %v1263_v3 = vld [vmem:[%s1889_s17 + $0x200] sm:$0xff]  ;;  %v1265_v4 = vld [vmem:[%s1889_s17 + $0x210] sm:$0xff]  ;;  %v1268_v5 = vld [vmem:[%s1889_s17 + $0x228] sm:$0xff]  ;;  %v1351_v7 = vpack.c.bf16 %v1248_v1, %v1246_v0  ;;  %s1291_s13 = sshll.u32 %s1086_s10, 7  ;;  %p1473_p3 = scmp.ne.s32.totalorder %s2043_s21, %s1472_s19 }
  0x6a   : > { %1317 = vmatpush1.bf16.msra.mxu1 %v1316_v23  ;;  %1337 = vmatprep.subr.bf16.mxu0 %v1336_v25  ;;  %v1270_v6 = vld [vmem:[%s1889_s17 + $0x238] sm:$0xff]  ;;  %v1364_v8 = vpack.c.bf16 %v1265_v4, %v1263_v3  ;;  %v1267_v10 = vld [vmem:[%s1889_s17 + $0x220] sm:$0xff]  ;;  %v1269_v11 = vld [vmem:[%s1889_s17 + $0x230] sm:$0xff]  ;;  %s1478_s27 = scalar_lea.vmem %s1477_s9, 512 }
  0x6b   : > { %1320 = vmatprep.subr.msk.bf16.mxu1 %vm1960_vm3, %v1318_v28  ;;  %v1366_v9 = vpack.c.bf16 %v1270_v6, %v1268_v5  ;;  %v1272_v12 = vld [vmem:[%s1889_s17 + $0x248] sm:$0xff]  ;;  %v1274_v13 = vld [vmem:[%s1889_s17 + $0x258] sm:$0xff]  ;;  %v1368_v15 = vpack.c.bf16 %v1269_v11, %v1267_v10  ;;  %v1271_v17 = vld [vmem:[%s1889_s17 + $0x240] sm:$0xff]  ;;  %p1474_p4 = pnand %p1473_p3, %p1672_p8  ;;  %p1480_p7 = scmp.lt.s32.totalorder %s1478_s27, %s1472_s19 }
  0x6c   : > { %v1221_v14 = vld [vmem:[%s2098_s3 + $0x8] sm:$0xff]  ;;  %v1370_v16 = vpack.c.bf16 %v1274_v13, %v1272_v12  ;;  %v1273_v18 = vld [vmem:[%s1889_s17 + $0x250] sm:$0xff]  ;;  %v1278_v21 = vld [vmem:[%s1889_s17 + $0x278] sm:$0xff] }
  0x6d   : > { %1339 = vmatpush1.bf16.msra.mxu0 %v1338_v35  ;;  %v1276_v19 = vld [vmem:[%s1889_s17 + $0x268] sm:$0xff]  ;;  %v1372_v22 = vpack.c.bf16 %v1273_v18, %v1271_v17  ;;  %v1275_v24 = vld [vmem:[%s1889_s17 + $0x260] sm:$0xff]  ;;  %v1277_v25 = vld [vmem:[%s1889_s17 + $0x270] sm:$0xff]  ;;  %p1475_p5 = pneg %p1474_p4  ;;  %p1481_p10 = por %p1480_p7, %p1479_p6 }
  0x6e   : > { %1323 = vmatpush1.bf16.msk.msra.mxu1 %vm1960_vm3, %v1321_v36  ;;  %1341 = vmatprep.subr.bf16.mxu0 %v1340_v38  ;;  %v1374_v23 = vpack.c.bf16 %v1278_v21, %v1276_v19  ;;  %v1280_v26 = vld [vmem:[%s1889_s17 + $0x288] sm:$0xff]  ;;  %v1282_v27 = vld [vmem:[%s1889_s17 + $0x298] sm:$0xf]  ;;  %v1376_v28 = vpack.c.bf16 %v1277_v25, %v1275_v24  ;;  %v1279_v30 = vld [vmem:[%s1889_s17 + $0x280] sm:$0xff] }
  0x6f   : > { %1355 = vmatprep.subr.bf16.mxu1 %v1354_v41  ;;  %v1378_v29 = vpack.c.bf16 %v1282_v27, %v1280_v26  ;;  %v1281_v31 = vld [vmem:[%s1889_s17 + $0x290] sm:$0xf]  ;;  %v987_v1 = vld [vmem:[%s2099_s4] sm:$0xff]  ;;  %s2041_s17 = scalar_lea.hbm %s2102_s7, %s1291_s13  ;;  %p1482_p11 = pnand %p1481_p10, %p1475_p5 }
  0x70   : > { %v1381_v33 = vpack.c.bf16 %v1281_v31, %v1279_v30 }
  0x71   : > { %1220 = vmatmul.mubr.msk.f32.vlgmr.msra.gmra.mrb[0].mxu1 %vm664_vm4, %v628_v47  ;;  %1343 = vmatpush1.bf16.msra.mxu0 %v1342_v49 }
  0x72   : > { %1357 = vmatpush1.bf16.msra.mxu1 %v1356_v50  ;;  %1345 = vmatprep.subr.bf16.mxu0 %v1344_v51 }
  0x73   : > { %1359 = vmatprep.subr.bf16.mxu1 %v1358_v55  ;;  %978 = vmatprep.mubr.f32.mxu1 %v1568_v20 }
  0x75   : > { %1347 = vmatpush1.bf16.msra.mxu0 %v1346_v61 }
  0x76   : > { %1361 = vmatpush1.bf16.msra.mxu1 %v1360_v62  ;;  %1350 = vmatprep.subr.msk.bf16.mxu0 %vm1960_vm3, %v1348_v63 }
  0x77   : > { %1363 = vmatprep.subr.bf16.mxu1 %v1362_v2 }
  0x79   : > { %1353 = vmatpush1.bf16.msk.msra.mxu0 %vm1960_vm3, %v1351_v7 }
  0x7a   : > { %1365 = vmatpush1.bf16.msra.mxu1 %v1364_v8 }
  0x7b   : > { %1367 = vmatprep.subr.bf16.mxu1 %v1366_v9 }
  0x7c   : > { %1253 = vmatmul.mubr.msk.f32.vlgmr.msra.gmra.mrb[2].mxu0 %vm664_vm4, %v1221_v14 }
  0x7d   : > { %1062 = vmatprep.mubr.f32.mxu0 %v1568_v20  ;;  %v1254_v20 = vld [vmem:[%s2098_s3 + $0x10] sm:$0xff] }
  0x7e   : > { %1369 = vmatpush1.bf16.msra.mxu1 %v1368_v15 }
  0x7f   : > { %1371 = vmatprep.subr.bf16.mxu1 %v1370_v16 }
  0x82   : > { %1373 = vmatpush1.bf16.msra.mxu1 %v1372_v22 }
  0x83   : > { %1375 = vmatprep.subr.bf16.mxu1 %v1374_v23 }
  0x86   : > { %1377 = vmatpush1.bf16.msra.mxu1 %v1376_v28 }
  0x87   : > { %1380 = vmatprep.subr.msk.bf16.mxu1 %vm1960_vm3, %v1378_v29 }
  0x8a   : > { %1383 = vmatpush1.bf16.msk.msra.mxu1 %vm1960_vm3, %v1381_v33 }
  0x8d   : > { %1286 = vmatmul.mubr.msk.f32.vlgmr.msra.gmra.mrb[2].mxu1 %vm664_vm4, %v1254_v20 }
  0xcf   : > { %v542_v36 = vpop.permute.xlu0 %541  ;;  %v783_v51 = vpop.permute.xlu1 %782 }
  0xd3   : > { %v662_v38 = vpop.permute.xlu0 %661  ;;  %v903_v53 = vpop.permute.xlu1 %902 }
  0xe7   : > { %v992_v2 = vpop.permute.xlu0 %991 }
 0x133   : > { %v621_v34 = vpop.f32.mrb[0].mxu0 }
 0x134   : > { %v623_v35 = vpop.f32.mrb[1].mxu0  ;;  %v622_v37 = vadd.f32 %v621_v34, %v542_v36 }
 0x135   : > { %v624_v39 = vadd.f32 %v623_v35, %v542_v36 }
 0x136   : > { %v626_v41 = vmax.f32 %v622_v37, 0.0 }
 0x137   : > { %v627_v44 = vmax.f32 %v624_v39, 0.0 }
 0x144   : > { %v740_v40 = vpop.f32.mrb[0].mxu1 }
 0x145   : > { %v741_v42 = vadd.f32 %v740_v40, %v662_v38  ;;  %v742_v43 = vpop.f32.mrb[1].mxu1 }
 0x146   : > { %v743_v45 = vadd.f32 %v742_v43, %v662_v38 }
 0x147   : > { %v745_v32 = vmax.f32 %v741_v42, 0.0 }
 0x148   : > { %v746_v46 = vmax.f32 %v743_v45, 0.0 }
 0x149   : > { %v1386_v47 = vpack.c.bf16 %v745_v32, %v626_v41 }
 0x14a   : > { %v1384_v48 = vpack.c.bf16 %v746_v46, %v627_v44 }
 0x14c   : > { %1385 = vmatprep.subr.bf16.mxu0 %v1384_v48 }
 0x14d   : > { %1387 = vmatpush1.bf16.msra.mxu0 %v1386_v47 }
 0x14f   : > { %v860_v49 = vpop.f32.mrb[2].mxu0 }
 0x150   : > { %v862_v50 = vpop.f32.mrb[3].mxu0  ;;  %v861_v52 = vadd.f32 %v860_v49, %v783_v51 }
 0x151   : > { %v863_v54 = vadd.f32 %v862_v50, %v783_v51 }
 0x152   : > { %v865_v59 = vmax.f32 %v861_v52, 0.0 }
 0x153   : > { %v866_v61 = vmax.f32 %v863_v54, 0.0 }
 0x160   : > { %v980_v55 = vpop.f32.mrb[2].mxu1 }
 0x161   : > { %v981_v56 = vadd.f32 %v980_v55, %v903_v53  ;;  %v982_v57 = vpop.f32.mrb[3].mxu1 }
 0x162   : > { %v983_v58 = vadd.f32 %v982_v57, %v903_v53 }
 0x163   : > { %v985_v60 = vmax.f32 %v981_v56, 0.0 }
 0x164   : > { %v986_v62 = vmax.f32 %v983_v58, 0.0 }
 0x165   : > { %v1390_v63 = vpack.c.bf16 %v985_v60, %v865_v59 }
 0x166   : > { %v1388_v0 = vpack.c.bf16 %v986_v62, %v866_v61 }
 0x168   : > { %1389 = vmatprep.subr.bf16.mxu0 %v1388_v0 }
 0x169   : > { %1391 = vmatpush1.bf16.msra.mxu0 %v1390_v63 }
 0x16c   : > { %1287 = vmatmul.mubr.msk.f32.vlgmr.msra.gmra.mrb[4].mxu0 %vm994_vm5, %v987_v1 }
 0x23f   : > { %v1064_v3 = vpop.f32.mrb[4].mxu0 }
 0x240   : > { %v1065_v4 = vadd.f32 %v1064_v3, %v992_v2  ;;  %v1066_v5 = vpop.f32.mrb[5].mxu0 }
 0x241   : > { %v1067_v6 = vadd.f32 %v1066_v5, %v992_v2 }
 0x242   : > { %v1069_v7 = vmax.f32 %v1065_v4, 0.0 }
 0x243   : > { %v1070_v8 = vmax.f32 %v1067_v6, 0.0 }
 0x244   : > { %1071 = vst [vmem:[%s519_s14] sm:$0xff] %v1069_v7 }
 0x245   : > { %1072 = vst [vmem:[%s519_s14 + $0x8] sm:$0xff] %v1070_v8 }
 0x246   : > { %1485 = shalt.err (!%p1482_p11)
}
 0x247   : > { %s1486_s12 = scalar_lea.hbm %s2041_s17, 256  ;;  %s1490_s14 = scalar_lea.hbm %s2102_s7, 1024 }
 0x248   : > { %p1487_p12 = scmp.ne.s32.totalorder %s2041_s17, %s1486_s12  ;;  %p1491_p1 = scmp.lt.u32.totalorder %s2041_s17, %s2102_s7 }
 0x249   : > { %p1492_p2 = scmp.lt.u32.totalorder %s1490_s14, %s1486_s12  ;;  %p1494_p4 = scmp.lt.u32.totalorder %s1486_s12, %s2041_s17 }
 0x24a   : > { %p1488_p13 = pnand %p1487_p12, %p1672_p8 }
 0x24b   : > { %p1493_p3 = por %p1492_p2, %p1491_p1 }
 0x24c   : > { %p1489_p0 = pneg %p1488_p13 }
 0x24d   : > { %p1495_p5 = por %p1494_p4, %p1493_p3 }
 0x24f   : > { %p1496_p6 = pnand %p1495_p5, %p1489_p0 }
 0x251   : > { %1499 = shalt.err (!%p1496_p6)
}
 0x252   : > { %1395 = dma.vmem_to_hbm [thread:$0]  (%p1672_p8), %s2043_s21, 256, %s2041_s17, %s1074_s28  }
 0x253 PF: > { %p1401_p7 = scmp.ge.s32.totalorder %s1566_s8, 2  ;;  %s1102_s19 = sand.u32 1, %s1538_s24  }
 0x254   : > { %s1103_s18 = scalar_lea.sflag [#allocation4], %s1102_s19 }
 0x255   : > { %p1398_p10 = pnand %p1401_p7, %p1676_p9 }
 0x257   : > { %1533 = dma.done.wait (!%p1398_p10), %s1103_s18, 256  }
 0x258   : > { %1535 = vsyncadd (!%p1398_p10), %s1103_s18, 4294967040  ;;  %s20_s8 = sadd.s32 1, %s1566_s8   ;;  %s2110_s15 = sld [smem:[#allocation6_spill]] }
 0x259   : > { %p17_p11 = scmp.ge.s32.totalorder %s20_s8, 6   ;;  %s2111_s24 = smov %s1542_s25 }
 0x25a   : > { %s2112_s25 = smov %s1546_s26  ;;  %s2113_s26 = smov %s1684_s20 }
 0x25b   : > { %s2114_s27 = smov %s1558_s29  ;;  %s2115_s28 = smov %s1562_s30 }
 0x25c   : > { %s2116_s29 = smov %s2119_s11  ;;  %19 = sbr.rel (!%p17_p11) target bundleno = 5 (0x5), region = 124 }
 0x25e   : > { %s2117_s30 = smov %s2110_s15 }
 0x263   :  { %1108 = vsyncpa [#allocation4], 1 }
 0x264   :  { %1110 = vsyncpa [#allocation4 + $0x1], 1 }

</bundles_post_ra>
